<compile_context>
chip_gen: v7x
topology: tpu7x:2x2x1
jax: 0.10.0
libtpu: 0.0.40
codegen_flags: <defaults>
</compile_context>

<pallas_src>
import jax
import jax.numpy as jnp
from jax.experimental import pallas as pl
from jax.experimental.pallas import tpu as pltpu


HIDDEN = 256


def _critic_kernel(x_ref, w1_ref, b1_ref, w2_ref, b2_ref, w3_ref, b3_ref,
                   out_ref):
    # layer1: relu(x @ W1 + b1) -- bf16 operands, f32 accumulate, f32 bias/ReLU.
    h1 = jnp.dot(x_ref[...], w1_ref[...], preferred_element_type=jnp.float32)
    h1 = jnp.maximum(h1 + b1_ref[...], 0.0)

    # layer2: relu(h1 @ W2 + b2) -- cast activations back to bf16 for the MXU.
    h2 = jnp.dot(h1.astype(jnp.bfloat16), w2_ref[...],
                 preferred_element_type=jnp.float32)
    h2 = jnp.maximum(h2 + b2_ref[...], 0.0)

    # layer3: N=1 -> VPU multiply + cross-lane (XLU) reduction, skip the MXU.
    # w3 is stored as an f32 (1, 256) row; single (TB, 1) column store per tile.
    out_ref[...] = (jnp.sum(h2 * w3_ref[...], axis=-1, keepdims=True)
                    + b3_ref[...])


def critic_forward(state, action, packed_params, *, tb=512):
    """state: (B, state_dim) f32, action: (B, action_dim) f32 -> (B, 1) f32."""
    w1, b1, w2, b2, w3, b3 = packed_params
    B = state.shape[0]
    in1 = state.shape[1] + action.shape[1]
    H = w1.shape[1]

    # concat == merged layer-1 matmul; cast the activation stream to bf16.
    x = jnp.concatenate([state, action], axis=1).astype(jnp.bfloat16)

    # Batch tile: clamp to the batch, then round up to a multiple of 8 sublanes.
    tb = max(8, min(tb, pl.next_power_of_2(B)))
    tb = pl.cdiv(tb, 8) * 8
    b_pad = pl.cdiv(B, tb) * tb
    if b_pad != B:
        x = jnp.pad(x, ((0, b_pad - B), (0, 0)))
    grid = (b_pad // tb,)

    const = lambda shape: pl.BlockSpec(shape, lambda i: (0, 0))

    out = pl.pallas_call(
        _critic_kernel,
        out_shape=jax.ShapeDtypeStruct((b_pad, 1), jnp.float32),
        grid=grid,
        in_specs=[
            pl.BlockSpec((tb, in1), lambda i: (i, 0)),   # activations: batch-tiled
            const((in1, H)), const((1, H)),              # layer1 weight/bias (resident)
            const((H, H)), const((1, H)),                # layer2 weight/bias (resident)
            const((1, H)), const((1, 1)),                # layer3 row + bias (resident)
        ],
        out_specs=pl.BlockSpec((tb, 1), lambda i: (i, 0)),
        compiler_params=pltpu.CompilerParams(
            dimension_semantics=("parallel",),  # v7x shards the batch over 2 TCs
        ),
    )(x, w1, b1, w2, b2, w3, b3)

    return out[:B]


def init_critic_params(key, state_dim, action_dim, hidden=HIDDEN):
    """PyTorch nn.Linear default init U(-1/sqrt(fan_in), 1/sqrt(fan_in)).

    Weights are stored as (in, out) (i.e. PyTorch W.T) so the kernel computes
    x @ W directly; W3 is stored as a (1, hidden) row for the VPU reduction.
    """
    k1, k2, k3, k4, k5, k6 = jax.random.split(key, 6)
    in1 = state_dim + action_dim

    def u(k, shape, fan_in):
        bound = 1.0 / jnp.sqrt(fan_in)
        return jax.random.uniform(k, shape, jnp.float32, -bound, bound)

    w1 = u(k1, (in1, hidden), in1)        # == PyTorch W1.T
    b1 = u(k2, (1, hidden), in1)
    w2 = u(k3, (hidden, hidden), hidden)  # == PyTorch W2.T
    b2 = u(k4, (1, hidden), hidden)
    w3 = u(k5, (1, hidden), hidden)       # == PyTorch W3 (row)
    b3 = u(k6, (1, 1), hidden)
    return (w1, b1, w2, b2, w3, b3)


def pack_critic_params(params):
    """Device-ready dtypes: bf16 MXU weights, f32 biases / layer-3 row."""
    w1, b1, w2, b2, w3, b3 = params
    return (w1.astype(jnp.bfloat16), b1,
            w2.astype(jnp.bfloat16), b2,
            w3, b3)


def _reference(state, action, params):
    """Pure-JAX f32 reference matching the PyTorch forward."""
    w1, b1, w2, b2, w3, b3 = params
    x = jnp.concatenate([state, action], axis=1)
    h1 = jnp.maximum(x @ w1 + b1, 0.0)
    h2 = jnp.maximum(h1 @ w2 + b2, 0.0)
    return h2 @ w3.T + b3


if __name__ == "__main__":
    key = jax.random.PRNGKey(0)
    kp, ks, ka = jax.random.split(key, 3)

    batch, state_dim, action_dim = 64, 16, 8
    params = init_critic_params(kp, state_dim, action_dim)
    packed = pack_critic_params(params)

    state = jax.random.normal(ks, (batch, state_dim), jnp.float32)
    action = jax.random.normal(ka, (batch, action_dim), jnp.float32)

    # tb=32 -> grid=(2,) so the batch pipeline is actually exercised.
    q = critic_forward(state, action, packed, tb=32)
    jax.block_until_ready(q)

    q_ref = _reference(state, action, params)
    assert q.shape == (batch, 1)
    # bf16 weights/activations on the MXU (f32 accumulate) -> loosened tolerance.
    err = float(jnp.max(jnp.abs(q - q_ref)))
    assert jnp.allclose(q, q_ref, atol=2e-2, rtol=2e-2), f"max abs err {err}"

    print("KERNEL_OK")
</pallas_src>

<mosaic_0001>
module attributes {stable_mosaic.version = 11 : i64} {
  func.func @_critic_kernel(%arg0: i32, %arg1: memref<32x24xbf16, #tpu.memory_space<vmem>>, %arg2: memref<24x256xbf16, #tpu.memory_space<vmem>>, %arg3: memref<1x256xf32, #tpu.memory_space<vmem>>, %arg4: memref<256x256xbf16, #tpu.memory_space<vmem>>, %arg5: memref<1x256xf32, #tpu.memory_space<vmem>>, %arg6: memref<1x256xf32, #tpu.memory_space<vmem>>, %arg7: memref<1x1xf32, #tpu.memory_space<vmem>>, %arg8: memref<32x1xf32, #tpu.memory_space<vmem>>) attributes {dimension_semantics = [#tpu.dimension_semantics<parallel>], iteration_bounds = array<i64: 2>, scalar_prefetch = 0 : i64, scratch_operands = 0 : i64, tpu.core_type = #tpu.core_type<tc>, window_params = [{transform_indices = @transform_0, window_bounds = array<i64: 32, 24>}, {pipeline_mode = #tpu.pipeline_mode<synchronous>, transform_indices = @transform_1, window_bounds = array<i64: 24, 256>}, {pipeline_mode = #tpu.pipeline_mode<synchronous>, transform_indices = @transform_2, window_bounds = array<i64: 1, 256>}, {pipeline_mode = #tpu.pipeline_mode<synchronous>, transform_indices = @transform_3, window_bounds = array<i64: 256, 256>}, {pipeline_mode = #tpu.pipeline_mode<synchronous>, transform_indices = @transform_4, window_bounds = array<i64: 1, 256>}, {pipeline_mode = #tpu.pipeline_mode<synchronous>, transform_indices = @transform_5, window_bounds = array<i64: 1, 256>}, {pipeline_mode = #tpu.pipeline_mode<synchronous>, transform_indices = @transform_6, window_bounds = array<i64: 1, 1>}, {transform_indices = @transform_7, window_bounds = array<i64: 32, 1>}]} {
    %c0 = arith.constant 0 : index
    %c0_0 = arith.constant 0 : index
    %0 = vector.load %arg1[%c0, %c0_0] : memref<32x24xbf16, #tpu.memory_space<vmem>>, vector<32x24xbf16>
    %c0_1 = arith.constant 0 : index
    %c0_2 = arith.constant 0 : index
    %1 = vector.load %arg2[%c0_1, %c0_2] : memref<24x256xbf16, #tpu.memory_space<vmem>>, vector<24x256xbf16>
    %cst = arith.constant dense<0.000000e+00> : vector<32x256xf32>
    %2 = tpu.matmul %0, %1, %cst {dimension_numbers = #tpu.dot_dimension_numbers<[1], [0], [0], [1], [0, 0, 1, 1], [], []>} : vector<32x24xbf16>, vector<24x256xbf16>, vector<32x256xf32> -> vector<32x256xf32>
    %c0_3 = arith.constant 0 : index
    %c0_4 = arith.constant 0 : index
    %3 = vector.load %arg3[%c0_3, %c0_4] : memref<1x256xf32, #tpu.memory_space<vmem>>, vector<1x256xf32>
    %4 = vector.broadcast %3 : vector<1x256xf32> to vector<32x256xf32>
    %5 = arith.addf %2, %4 : vector<32x256xf32>
    %cst_5 = arith.constant 0.000000e+00 : f32
    %6 = vector.broadcast %cst_5 : f32 to vector<32x256xf32>
    %7 = arith.maximumf %5, %6 : vector<32x256xf32>
    %8 = arith.truncf %7 : vector<32x256xf32> to vector<32x256xbf16>
    %c0_6 = arith.constant 0 : index
    %c0_7 = arith.constant 0 : index
    %9 = vector.load %arg4[%c0_6, %c0_7] : memref<256x256xbf16, #tpu.memory_space<vmem>>, vector<256x256xbf16>
    %cst_8 = arith.constant dense<0.000000e+00> : vector<32x256xf32>
    %10 = tpu.matmul %8, %9, %cst_8 {dimension_numbers = #tpu.dot_dimension_numbers<[1], [0], [0], [1], [0, 0, 1, 1], [], []>} : vector<32x256xbf16>, vector<256x256xbf16>, vector<32x256xf32> -> vector<32x256xf32>
    %c0_9 = arith.constant 0 : index
    %c0_10 = arith.constant 0 : index
    %11 = vector.load %arg5[%c0_9, %c0_10] : memref<1x256xf32, #tpu.memory_space<vmem>>, vector<1x256xf32>
    %12 = vector.broadcast %11 : vector<1x256xf32> to vector<32x256xf32>
    %13 = arith.addf %10, %12 : vector<32x256xf32>
    %cst_11 = arith.constant 0.000000e+00 : f32
    %14 = vector.broadcast %cst_11 : f32 to vector<32x256xf32>
    %15 = arith.maximumf %13, %14 : vector<32x256xf32>
    %c0_12 = arith.constant 0 : index
    %c0_13 = arith.constant 0 : index
    %16 = vector.load %arg6[%c0_12, %c0_13] : memref<1x256xf32, #tpu.memory_space<vmem>>, vector<1x256xf32>
    %17 = vector.broadcast %16 : vector<1x256xf32> to vector<32x256xf32>
    %18 = arith.mulf %15, %17 : vector<32x256xf32>
    %cst_14 = arith.constant dense<0.000000e+00> : vector<32xf32>
    %19 = vector.multi_reduction <add>, %18, %cst_14 [1] : vector<32x256xf32> to vector<32xf32>
    %20 = vector.shape_cast %19 : vector<32xf32> to vector<32x1xf32>
    %c0_15 = arith.constant 0 : index
    %c0_16 = arith.constant 0 : index
    %21 = vector.load %arg7[%c0_15, %c0_16] : memref<1x1xf32, #tpu.memory_space<vmem>>, vector<1x1xf32>
    %22 = vector.broadcast %21 : vector<1x1xf32> to vector<32x1xf32>
    %23 = arith.addf %20, %22 : vector<32x1xf32>
    %c0_17 = arith.constant 0 : index
    %c0_18 = arith.constant 0 : index
    %24 = vector.load %arg8[%c0_17, %c0_18] : memref<32x1xf32, #tpu.memory_space<vmem>>, vector<32x1xf32>
    tpu.vector_store %arg8[%c0_17, %c0_18], %23 {strides = array<i32>} : memref<32x1xf32, #tpu.memory_space<vmem>>, vector<32x1xf32>,
    return
  }
  func.func @transform_0(%arg0: i32) -> (i32, i32) {
    %c0_i32 = arith.constant 0 : i32
    %c0_i32_0 = arith.constant 0 : i32
    return %arg0, %c0_i32 : i32, i32
  }
  func.func @transform_1(%arg0: i32) -> (i32, i32) {
    %c0_i32 = arith.constant 0 : i32
    %c0_i32_0 = arith.constant 0 : i32
    %c0_i32_1 = arith.constant 0 : i32
    return %c0_i32, %c0_i32_0 : i32, i32
  }
  func.func @transform_2(%arg0: i32) -> (i32, i32) {
    %c0_i32 = arith.constant 0 : i32
    %c0_i32_0 = arith.constant 0 : i32
    %c0_i32_1 = arith.constant 0 : i32
    return %c0_i32, %c0_i32_0 : i32, i32
  }
  func.func @transform_3(%arg0: i32) -> (i32, i32) {
    %c0_i32 = arith.constant 0 : i32
    %c0_i32_0 = arith.constant 0 : i32
    %c0_i32_1 = arith.constant 0 : i32
    return %c0_i32, %c0_i32_0 : i32, i32
  }
  func.func @transform_4(%arg0: i32) -> (i32, i32) {
    %c0_i32 = arith.constant 0 : i32
    %c0_i32_0 = arith.constant 0 : i32
    %c0_i32_1 = arith.constant 0 : i32
    return %c0_i32, %c0_i32_0 : i32, i32
  }
  func.func @transform_5(%arg0: i32) -> (i32, i32) {
    %c0_i32 = arith.constant 0 : i32
    %c0_i32_0 = arith.constant 0 : i32
    %c0_i32_1 = arith.constant 0 : i32
    return %c0_i32, %c0_i32_0 : i32, i32
  }
  func.func @transform_6(%arg0: i32) -> (i32, i32) {
    %c0_i32 = arith.constant 0 : i32
    %c0_i32_0 = arith.constant 0 : i32
    %c0_i32_1 = arith.constant 0 : i32
    return %c0_i32, %c0_i32_0 : i32, i32
  }
  func.func @transform_7(%arg0: i32) -> (i32, i32) {
    %c0_i32 = arith.constant 0 : i32
    %c0_i32_0 = arith.constant 0 : i32
    return %arg0, %c0_i32 : i32, i32
  }
}

</mosaic_0001>

<bundles_post_ra>
// kernel: tpu_custom_call.1
= control target key start
LH: loop header
LB: loop body
LE: loop exit
PB: predicated region body
PF: predicated region fallthrough
CT: control target
= control target key end

     0   :  { %s1106_s0 = inlined_call_operand.vmem [shape: bf16[64,24], index: 0, kind: input, shape index: {}]   ;;  %s1107_s1 = inlined_call_operand.vmem [shape: bf16[24,256], index: 1, kind: input, shape index: {}]   ;;  %s1108_s2 = inlined_call_operand.vmem [shape: f32[1,256], index: 2, kind: input, shape index: {}]   ;;  %s1109_s3 = inlined_call_operand.hbm [shape: bf16[256,256], index: 3, kind: input, shape index: {}]   ;;  %s1110_s4 = inlined_call_operand.vmem [shape: f32[1,256], index: 4, kind: input, shape index: {}]   ;;  %s1111_s5 = inlined_call_operand.vmem [shape: f32[1,256], index: 5, kind: input, shape index: {}]   ;;  %s1112_s6 = inlined_call_operand.<no memory space> [shape: f32[1,1], index: 6, kind: input, shape index: {}]   ;;  %s1113_s7 = inlined_call_operand.vmem [shape: f32[64,1], index: 7, kind: output, shape index: {}]  }
   0x1   :  { %v12_v0 = vstv %s1112_s6 }
   0x2   :  { %13 = vst [vmem:[#allocation2] sm:$0x1] %v12_v0 }
   0x3   :  { %14 = vsyncpa [#allocation4], 0  ;;  %s1023_s26 = smov 0  }
   0x4 LB: > { %s804_s27 = sadd.s32 4294967295, %s974_s26   ;;  %p806_p0 = scmp.ge.s32.totalorder %s974_s26, 1  ;;  %s974_s26 = sphi %s1023_s26, %s20_s26  }
   0x5   : > { %p203_p1 = scmp.lt.s32.totalorder %s974_s26, 3  ;;  %s976_s28 = smov [#allocation3]  }
   0x6   : > { %s221_s29 = sshll.u32 %s976_s28, 4  ;;  %p1037_p3 = scmp.eq.s32.totalorder %s804_s27, 0  ;;  %s222_s29 = int_to_ptr.vmem [resolvable:$true] %s221_s29 }
   0x7   : > { %p1031_p2 = pnand %p806_p0, %p203_p1  ;;  %s936_s11 = scalar_lea.hbm %s1109_s3, 4096 }
   0x8   : > { %s1118_s30 = scalar_select %p1037_p3, 1, 0 }
   0x9   : > { %s1117_s6 = scalar_select %p1031_p2, 1, 0 }
   0xa   : > { %p863_p4 = pneg %p1031_p2  ;;  %p937_p6 = scmp.ne.s32.totalorder %s1109_s3, %s936_s11 }
   0xb   : > { %p943_p10 = scmp.lt.u32.totalorder %s936_s11, %s1109_s3 }
   0xc   : > { %p1045_p5 = pnand %p1037_p3, %p863_p4 }
   0xe   : > { %p938_p7 = pneg %p1045_p5 }
  0x10   : > { %p939_p8 = pnand %p938_p7, %p937_p6 }
  0x12   : > { %p940_p9 = pneg %p939_p8 }
  0x14   : > { %p945_p11 = pnand %p943_p10, %p940_p9 }
  0x16   : > { %948 = shalt.err (!%p945_p11)
}
  0x17   : > { %s949_s16 = scalar_lea.vmem %s222_s29, 4096  ;;  %p957_p1 = scmp.lt.s32.totalorder %s222_s29, %s222_s29 }
  0x18   : > { %p950_p12 = scmp.ne.s32.totalorder %s222_s29, %s949_s16  ;;  %p958_p4 = scmp.lt.s32.totalorder %s949_s16, %s949_s16 }
  0x1a   : > { %p952_p13 = pnand %p950_p12, %p938_p7  ;;  %p959_p3 = por %p958_p4, %p957_p1 }
  0x1c   : > { %p953_p0 = pneg %p952_p13 }
  0x1e   : > { %p960_p2 = pnand %p959_p3, %p953_p0 }
  0x20   : > { %963 = shalt.err (!%p960_p2)
}
  0x21   : > { %s977_s17 = smov 128   ;;  %s978_s18 = smov 8  }
  0x22   : > { %866 = dma.hbm_to_vmem [thread:$0]  (!%p1045_p5), %s1109_s3, 4096, %s222_s29, [#allocation4], %s977_s17, %s977_s17, %s978_s18  }
  0x23   : > { %p1120_p6 = scmp.ne.s32.totalorder %s1117_s6, 0 }
  0x24   : > { %p1121_p8 = scmp.ne.s32.totalorder (!%p1120_p6), %s1118_s30, 0 }
  0x25   : > { %255 = sbr.rel (%p1120_p6) target bundleno = 654 (0x28e), region = 48 }
  0x2c   : > { %969 = dma.done.wait (%p1121_p8), [#allocation4], 4096  }
  0x2d   : > { %971 = vsyncadd (%p1121_p8), [#allocation4], 4294963200  ;;  %s811_s21 = sshll.u32 %s804_s27, 2  ;;  %v979_v1 = vmov 0   ;;  %v881_v2 = vld [vmem:[%s1107_s1 + $0x4] ss:$8 sps:$4 sm:$0xff]   ;;  %v309_v42 = vlaneseq }
  0x2e   : > { %390 = vmatprep.mubr.bf16.mxu0 %v979_v1  ;;  %p288_p2 = scmp.lt.s32.totalorder %s811_s21, 7  ;;  %v883_v3 = vld [vmem:[%s1107_s1] ss:$8 sps:$4 sm:$0xff]   ;;  %v306_v4 = vld [vmem:[%s1107_s1 + $0x10] sm:$0xff]  ;;  %vm351_vm0 = vcmask 1043456   ;;  %358 = vmatprep.subr.bf16.mxu0 %v881_v2  ;;  %vm344_vm1 = vcmask 195584  }
  0x2f   : > { %v820_v5 = vcombine.high %v306_v4, %v306_v4  ;;  %v819_v6 = vcombine.low %v306_v4, %v306_v4  ;;  %359 = vmatpush1.bf16.msra.mxu0 %v883_v3  ;;  %v888_v8 = vld [vmem:[#allocation3 + $0x4] ss:$8 sps:$4 sm:$0xff]   ;;  %v890_v9 = vld [vmem:[#allocation3] ss:$8 sps:$4 sm:$0xff]   ;;  %v891_v10 = vld [vmem:[#allocation3 + $0x14] ss:$8 sps:$4 sm:$0xff]  }
  0x30   : > { %s1123_s21 = smov (!%p288_p2, %s811_s21), 7  ;;  %627 = vmatprep.subr.bf16.mxu1 %v888_v8  ;;  %v893_v12 = vld [vmem:[#allocation3 + $0x10] ss:$8 sps:$4 sm:$0xff]   ;;  %v894_v13 = vld [vmem:[#allocation3 + $0x24] ss:$8 sps:$4 sm:$0xff]   ;;  %v310_v43 = vshrl.u32 %v309_v42, 7 }
  0x31   : > { %s812_s22 = sshll.u32 %s1123_s21, 2  ;;  %821 = vmatprep.subr.msk.bf16.mxu0 %vm351_vm0, %v820_v5  ;;  %v353_v7 = vsel %vm351_vm0, %v819_v6, 0  ;;  %628 = vmatpush1.bf16.msra.mxu1 %v890_v9  ;;  %v896_v14 = vld [vmem:[#allocation3 + $0x20] ss:$8 sps:$4 sm:$0xff]   ;;  %v897_v15 = vld [vmem:[#allocation3 + $0x34] ss:$8 sps:$4 sm:$0xff]  }
  0x32   : > { %s291_s29 = scalar_lea.vmem %s1106_s0, %s812_s22  ;;  %629 = vmatprep.subr.bf16.mxu1 %v891_v10  ;;  %v899_v17 = vld [vmem:[#allocation3 + $0x30] ss:$8 sps:$4 sm:$0xff]   ;;  %v900_v18 = vld [vmem:[#allocation3 + $0x44] ss:$8 sps:$4 sm:$0xff]   ;;  %v902_v19 = vld [vmem:[#allocation3 + $0x40] ss:$8 sps:$4 sm:$0xff]  }
  0x33   : > { %v886_v11 = vld [vmem:[%s291_s29] sm:$0xff]   ;;  %361 = vmatpush1.bf16.msra.mxu0 %v353_v7  ;;  %v887_v16 = vld [vmem:[%s291_s29 + $0x8] sm:$0xff]   ;;  %v905_v21 = vld [vmem:[#allocation3 + $0x50] ss:$8 sps:$4 sm:$0xff]   ;;  %v311_v44 = vsub.s32 0, %v310_v43  ;;  %v315_v46 = vsub.s32 1, %v310_v43 }
  0x34   : > { %v903_v20 = vld [vmem:[#allocation3 + $0x54] ss:$8 sps:$4 sm:$0xff]   ;;  %v906_v22 = vld [vmem:[#allocation3 + $0x64] ss:$8 sps:$4 sm:$0xff]   ;;  %v908_v23 = vld [vmem:[#allocation3 + $0x60] ss:$8 sps:$4 sm:$0xff]  }
  0x35   : > { %630 = vmatpush1.bf16.msra.mxu1 %v893_v12  ;;  %v909_v24 = vld [vmem:[#allocation3 + $0x74] ss:$8 sps:$4 sm:$0xff]   ;;  %v911_v25 = vld [vmem:[#allocation3 + $0x70] ss:$8 sps:$4 sm:$0xff]   ;;  %v912_v26 = vld [vmem:[#allocation3 + $0x84] ss:$8 sps:$4 sm:$0xff]  }
  0x36   : > { %822 = vmatmul.mubr.msk.bf16.vlgmr.msra.gmra.mrb[0].mxu0 %vm344_vm1, %v886_v11  ;;  %631 = vmatprep.subr.bf16.mxu1 %v894_v13  ;;  %v914_v27 = vld [vmem:[#allocation3 + $0x80] ss:$8 sps:$4 sm:$0xff]   ;;  %v915_v28 = vld [vmem:[#allocation3 + $0x94] ss:$8 sps:$4 sm:$0xff]   ;;  %v917_v29 = vld [vmem:[#allocation3 + $0x90] ss:$8 sps:$4 sm:$0xff]  }
  0x37   : > { %400 = vmatprep.mubr.bf16.mxu0 %v979_v1  ;;  %v918_v30 = vld [vmem:[#allocation3 + $0xa4] ss:$8 sps:$4 sm:$0xff]   ;;  %v920_v31 = vld [vmem:[#allocation3 + $0xa0] ss:$8 sps:$4 sm:$0xff]   ;;  %v921_v32 = vld [vmem:[#allocation3 + $0xb4] ss:$8 sps:$4 sm:$0xff]  }
  0x38   : > { %v923_v33 = vld [vmem:[#allocation3 + $0xb0] ss:$8 sps:$4 sm:$0xff]   ;;  %v924_v34 = vld [vmem:[#allocation3 + $0xc4] ss:$8 sps:$4 sm:$0xff]   ;;  %v926_v35 = vld [vmem:[#allocation3 + $0xc0] ss:$8 sps:$4 sm:$0xff]  }
  0x39   : > { %632 = vmatpush1.bf16.msra.mxu1 %v896_v14  ;;  %v927_v36 = vld [vmem:[#allocation3 + $0xd4] ss:$8 sps:$4 sm:$0xff]   ;;  %v929_v37 = vld [vmem:[#allocation3 + $0xd0] ss:$8 sps:$4 sm:$0xff]   ;;  %v930_v38 = vld [vmem:[#allocation3 + $0xe4] ss:$8 sps:$4 sm:$0xff]  }
  0x3a   : > { %633 = vmatprep.subr.bf16.mxu1 %v897_v15  ;;  %v932_v39 = vld [vmem:[#allocation3 + $0xe0] ss:$8 sps:$4 sm:$0xff]   ;;  %v933_v40 = vld [vmem:[#allocation3 + $0xf4] ss:$8 sps:$4 sm:$0xff]   ;;  %v935_v41 = vld [vmem:[#allocation3 + $0xf0] ss:$8 sps:$4 sm:$0xff]  }
  0x3b   : > { %v307_v45 = vld [vmem:[%s1108_s2] sm:$0x3]  ;;  %s814_s15 = sshll.u32 %s1123_s21, 3  ;;  %vm731_vm2 = vcmask 7168  }
  0x3c   : > { %v312_v47 = vrot.slane %v307_v45, %v311_v44  ;;  %v316_v48 = vrot.slane %v307_v45, %v315_v46  ;;  %v455_v13 = vld [vmem:[%s1110_s4] sm:$0x3]  ;;  %s297_s18 = scalar_lea.vmem %s1113_s7, %s814_s15 }
  0x3d   : > { %634 = vmatpush1.bf16.msra.mxu1 %v899_v17  ;;  %v460_v14 = vrot.slane %v455_v13, %v311_v44  ;;  %v464_v15 = vrot.slane %v455_v13, %v315_v46 }
  0x3e   : > { %823 = vmatmul.mubr.msk.bf16.gmra.mrb[4].mxu0 %vm344_vm1, %v887_v16  ;;  %635 = vmatprep.subr.bf16.mxu1 %v900_v18  ;;  %v688_v16 = vld [vmem:[%s1111_s5] sm:$0x3] }
  0x41   : > { %636 = vmatpush1.bf16.msra.mxu1 %v902_v19 }
  0x42   : > { %637 = vmatprep.subr.bf16.mxu1 %v903_v20  ;;  %v693_v20 = vrot.slane %v688_v16, %v311_v44 }
  0x45   : > { %638 = vmatpush1.bf16.msra.mxu1 %v905_v21 }
  0x46   : > { %639 = vmatprep.subr.bf16.mxu1 %v906_v22 }
  0x49   : > { %640 = vmatpush1.bf16.msra.mxu1 %v908_v23  ;;  %v697_v23 = vrot.slane %v688_v16, %v315_v46 }
  0x4a   : > { %641 = vmatprep.subr.bf16.mxu1 %v909_v24 }
  0x4d   : > { %642 = vmatpush1.bf16.msra.mxu1 %v911_v25 }
  0x4e   : > { %643 = vmatprep.subr.bf16.mxu1 %v912_v26 }
  0x51   : > { %644 = vmatpush1.bf16.msra.mxu1 %v914_v27 }
  0x52   : > { %645 = vmatprep.subr.bf16.mxu1 %v915_v28 }
  0x55   : > { %646 = vmatpush1.bf16.msra.mxu1 %v917_v29 }
  0x56   : > { %647 = vmatprep.subr.bf16.mxu1 %v918_v30 }
  0x59   : > { %648 = vmatpush1.bf16.msra.mxu1 %v920_v31 }
  0x5a   : > { %649 = vmatprep.subr.bf16.mxu1 %v921_v32 }
  0x5d   : > { %650 = vmatpush1.bf16.msra.mxu1 %v923_v33 }
  0x5e   : > { %651 = vmatprep.subr.bf16.mxu1 %v924_v34 }
  0x61   : > { %652 = vmatpush1.bf16.msra.mxu1 %v926_v35 }
  0x62   : > { %653 = vmatprep.subr.bf16.mxu1 %v927_v36 }
  0x65   : > { %654 = vmatpush1.bf16.msra.mxu1 %v929_v37 }
  0x66   : > { %655 = vmatprep.subr.bf16.mxu1 %v930_v38 }
  0x69   : > { %656 = vmatpush1.bf16.msra.mxu1 %v932_v39 }
  0x6a   : > { %657 = vmatprep.subr.bf16.mxu1 %v933_v40 }
  0x6d   : > { %658 = vmatpush1.bf16.msra.mxu1 %v935_v41 }
 0x109   : > { %v392_v49 = vpop.f32.mrb[0].mxu0 }
 0x10a   : > { %v393_v50 = vadd.f32 %v392_v49, %v312_v47  ;;  %v394_v51 = vpop.f32.mrb[1].mxu0 }
 0x10b   : > { %v395_v52 = vadd.f32 %v394_v51, %v316_v48  ;;  %v396_v53 = vpop.f32.mrb[2].mxu0 }
 0x10c   : > { %v397_v54 = vadd.f32 %v396_v53, %v312_v47  ;;  %v398_v55 = vpop.f32.mrb[3].mxu0  ;;  %v411_v57 = vmax.f32 %v393_v50, 0.0 }
 0x10d   : > { %v399_v56 = vadd.f32 %v398_v55, %v316_v48  ;;  %v412_v59 = vmax.f32 %v395_v52, 0.0  ;;  %v856_v55 = vld [vmem:[#allocation2] ss:$0 sm:$0xff] }
 0x10e   : > { %v413_v58 = vmax.f32 %v397_v54, 0.0 }
 0x10f   : > { %v414_v60 = vmax.f32 %v399_v56, 0.0 }
 0x110   : > { %v419_v61 = vpack.c.bf16 %v413_v58, %v411_v57 }
 0x111   : > { %v402_v62 = vpop.f32.mrb[4].mxu0  ;;  %v420_v63 = vpack.c.bf16 %v414_v60, %v412_v59 }
 0x112   : > { %v403_v0 = vadd.f32 %v402_v62, %v312_v47  ;;  %v404_v1 = vpop.f32.mrb[5].mxu0 }
 0x113   : > { %v405_v2 = vadd.f32 %v404_v1, %v316_v48  ;;  %v406_v3 = vpop.f32.mrb[6].mxu0  ;;  %659 = vmatprep.mubr.bf16.mxu1 %v420_v63 }
 0x114   : > { %v407_v4 = vadd.f32 %v406_v3, %v312_v47  ;;  %v408_v5 = vpop.f32.mrb[7].mxu0  ;;  %660 = vmatmul.mubr.bf16.vlgmr.msra.gmra.mrb[0].mxu1 %v419_v61  ;;  %v415_v7 = vmax.f32 %v403_v0, 0.0 }
 0x115   : > { %v409_v6 = vadd.f32 %v408_v5, %v316_v48  ;;  %v416_v9 = vmax.f32 %v405_v2, 0.0 }
 0x116   : > { %v417_v8 = vmax.f32 %v407_v4, 0.0 }
 0x117   : > { %v418_v10 = vmax.f32 %v409_v6, 0.0 }
 0x118   : > { %v421_v11 = vpack.c.bf16 %v417_v8, %v415_v7 }
 0x119   : > { %v422_v12 = vpack.c.bf16 %v418_v10, %v416_v9 }
 0x11b   : > { %669 = vmatprep.mubr.bf16.mxu1 %v422_v12 }
 0x11c   : > { %670 = vmatmul.mubr.bf16.gmra.mrb[4].mxu1 %v421_v11 }
 0x1e7   : > { %v661_v17 = vpop.f32.mrb[0].mxu1 }
 0x1e8   : > { %v662_v18 = vadd.f32 %v661_v17, %v460_v14  ;;  %v663_v19 = vpop.f32.mrb[1].mxu1 }
 0x1e9   : > { %v664_v21 = vadd.f32 %v663_v19, %v464_v15  ;;  %v665_v22 = vpop.f32.mrb[2].mxu1 }
 0x1ea   : > { %v680_v24 = vmax.f32 %v662_v18, 0.0  ;;  %v666_v25 = vadd.f32 %v665_v22, %v460_v14  ;;  %v667_v26 = vpop.f32.mrb[3].mxu1 }
 0x1eb   : > { %v681_v27 = vmax.f32 %v664_v21, 0.0  ;;  %v668_v28 = vadd.f32 %v667_v26, %v464_v15 }
 0x1ec   : > { %v682_v29 = vmax.f32 %v666_v25, 0.0  ;;  %v700_v30 = vmul.f32 %v693_v20, %v680_v24 }
 0x1ed   : > { %v683_v31 = vmax.f32 %v668_v28, 0.0  ;;  %v701_v32 = vmul.f32 %v697_v23, %v681_v27 }
 0x1ee   : > { %v702_v33 = vmul.f32 %v693_v20, %v682_v29 }
 0x1ef   : > { %v703_v34 = vmul.f32 %v697_v23, %v683_v31  ;;  %v671_v35 = vpop.f32.mrb[4].mxu1  ;;  %v708_v36 = vadd.f32 %v701_v32, %v700_v30 }
 0x1f0   : > { %v672_v37 = vadd.f32 %v671_v35, %v460_v14  ;;  %v673_v38 = vpop.f32.mrb[5].mxu1 }
 0x1f1   : > { %v674_v39 = vadd.f32 %v673_v38, %v464_v15  ;;  %v675_v40 = vpop.f32.mrb[6].mxu1  ;;  %709 = vadd.xlane.f32.xlu0 %v708_v36  ;;  %v711_v41 = vadd.f32 %v703_v34, %v702_v33 }
 0x1f2   : > { %v684_v42 = vmax.f32 %v672_v37, 0.0  ;;  %v676_v43 = vadd.f32 %v675_v40, %v460_v14  ;;  %v677_v44 = vpop.f32.mrb[7].mxu1 }
 0x1f3   : > { %v685_v45 = vmax.f32 %v674_v39, 0.0  ;;  %v678_v46 = vadd.f32 %v677_v44, %v464_v15 }
 0x1f4   : > { %v686_v47 = vmax.f32 %v676_v43, 0.0  ;;  %v704_v48 = vmul.f32 %v693_v20, %v684_v42 }
 0x1f5   : > { %v687_v49 = vmax.f32 %v678_v46, 0.0  ;;  %712 = vadd.xlane.f32.xlu0 %v711_v41  ;;  %v705_v50 = vmul.f32 %v697_v23, %v685_v45 }
 0x1f6   : > { %v706_v51 = vmul.f32 %v693_v20, %v686_v47 }
 0x1f7   : > { %v707_v52 = vmul.f32 %v697_v23, %v687_v49  ;;  %v714_v53 = vadd.f32 %v705_v50, %v704_v48 }
 0x1f9   : > { %715 = vadd.xlane.f32.xlu1 %v714_v53  ;;  %v717_v54 = vadd.f32 %v707_v52, %v706_v51 }
 0x1fd   : > { %718 = vadd.xlane.f32.xlu1 %v717_v54 }
 0x27e   : > { %v710_v56 = vpop.xlane.xlu0 %709 }
 0x27f   : > { %v727_v57 = vadd.f32 %v856_v55, %v710_v56 }
 0x281   : > { %732 = vst.msk [vmem:[%s297_s18] sm:$0xff] %vm731_vm2, %v727_v57 }
 0x282   : > { %v713_v58 = vpop.xlane.xlu0 %712 }
 0x283   : > { %v728_v59 = vadd.f32 %v856_v55, %v713_v58 }
 0x285   : > { %733 = vst.msk [vmem:[%s297_s18 + $0x8] sm:$0xff] %vm731_vm2, %v728_v59 }
 0x286   : > { %v716_v60 = vpop.xlane.xlu1 %715 }
 0x287   : > { %v729_v61 = vadd.f32 %v856_v55, %v716_v60 }
 0x289   : > { %734 = vst.msk [vmem:[%s297_s18 + $0x10] sm:$0xff] %vm731_vm2, %v729_v61 }
 0x28a   : > { %v719_v62 = vpop.xlane.xlu1 %718 }
 0x28b   : > { %v730_v63 = vadd.f32 %v856_v55, %v719_v62 }
 0x28d   : > { %735 = vst.msk [vmem:[%s297_s18 + $0x18] sm:$0xff] %vm731_vm2, %v730_v63 }
 0x28e PF: > { %s20_s26 = sadd.s32 1, %s974_s26  }
 0x28f   : > { %p17_p3 = scmp.ge.s32.totalorder %s20_s26, 4  }
 0x291   :  { %19 = sbr.rel (!%p17_p3) target bundleno = 4 (0x4), region = 83 }
 0x298   :  { %758 = vsyncpa [#allocation4], 1 }
 0x299   :  { %760 = vsyncpa [#allocation4 + $0x1], 1 }

</bundles_post_ra>
